<compile_context>
chip_gen: v7x
topology: tpu7x:2x2x1
jax: 0.10.0
libtpu: 0.0.40
codegen_flags: <defaults>
</compile_context>

<pallas_src>
import functools

import jax
import jax.numpy as jnp
from jax.experimental import pallas as pl
from jax.experimental.pallas import tpu as pltpu


def _lsce_kernel(x_ref, t_ref, out_ref, acc_lp, acc_nll, acc_cnt, *,
                 n_rows, n_classes, row_tile, tiles_per_split, ignore_index):
    s = pl.program_id(0)          # split (core) index      — "parallel"
    t = pl.program_id(1)          # tile index within split — "arbitrary"

    @pl.when(t == 0)
    def _():
        acc_lp[...] = jnp.zeros_like(acc_lp)
        acc_nll[...] = jnp.zeros_like(acc_nll)
        acc_cnt[...] = jnp.zeros_like(acc_cnt)

    x_nat = x_ref[...]                                  # (row_tile, C) native dtype
    tgt = t_ref[...]                                    # (row_tile, 1) int32

    # Row validity: rows past n_rows belong to padded / clamped blocks.
    global_tile = s * tiles_per_split + t
    row0 = global_tile * row_tile
    local_row = jax.lax.broadcasted_iota(jnp.int32, (row_tile, 1), 0)
    in_range = (row0 + local_row) < n_rows              # (row_tile, 1) bool

    # Lane max and the one-hot target pick stay in the native dtype (half the
    # VALU work / vreg pressure for bf16; both are exact).  The class iota is
    # a single (1, C) strip broadcast against the targets instead of a
    # (row_tile, C) int32 temporary.
    m_nat = jnp.max(x_nat, axis=-1, keepdims=True)      # (row_tile, 1)
    col = jax.lax.broadcasted_iota(jnp.int32, (1, n_classes), 1)
    onehot = col == tgt                                 # (row_tile, C) bool
    picked_nat = jnp.sum(jnp.where(onehot, x_nat, 0.0),
                         axis=-1, keepdims=True)        # exact: single non-zero

    # Widen only for the exp / lse / shifted-sum path.
    m = m_nat.astype(jnp.float32)
    xs = x_nat.astype(jnp.float32) - m                  # shifted logits, f32
    lse = jnp.log(jnp.sum(jnp.exp(xs), axis=-1, keepdims=True))
    sum_xs = jnp.sum(xs, axis=-1, keepdims=True)
    # sum_j log p_ij = sum_j (x_ij - m_i) - C * lse_i
    row_logp_sum = sum_xs - float(n_classes) * lse
    picked_logp = picked_nat.astype(jnp.float32) - m - lse   # log p[i, target[i]]

    valid = in_range & (tgt != ignore_index)            # (row_tile, 1) bool

    # Per-step scalar reductions (XLU) into tiny running accumulators instead
    # of per-row (row_tile, 1) accumulators: frees the VALU and keeps scratch
    # size constant regardless of row_tile.
    acc_lp[...] += jnp.sum(jnp.where(in_range, row_logp_sum, 0.0), keepdims=True)
    acc_nll[...] += jnp.sum(jnp.where(valid, -picked_logp, 0.0), keepdims=True)
    acc_cnt[...] += jnp.sum(valid.astype(jnp.float32), keepdims=True)

    @pl.when(t == pl.num_programs(1) - 1)
    def _():
        # Per-split partial sums, packed into sublanes 0/1/2 of a full
        # (8, 128)-aligned output block (lane-dense, unmasked store).
        sum_lp = jnp.sum(acc_lp[...])
        sum_nll = jnp.sum(acc_nll[...])
        cnt = jnp.sum(acc_cnt[...])
        sub = jax.lax.broadcasted_iota(jnp.int32, (1, 8, 128), 1)
        out_ref[...] = jnp.where(
            sub == 0, sum_lp,
            jnp.where(sub == 1, sum_nll,
                      jnp.where(sub == 2, cnt, 0.0)))


def _chip_info():
    """Best-effort (per-core VMEM bytes, device hides 2 TensorCores?)."""
    vmem_bytes = 64 << 20          # conservative default (v7x per-core VMEM)
    megacore = False
    try:
        kind = jax.devices()[0].device_kind.lower()
        if ("v7" in kind) or ("v4" in kind) or ("v5p" in kind):
            megacore = True        # two TensorCores behind one device
        if ("v6" in kind) or ("v5e" in kind) or ("v5 lite" in kind):
            vmem_bytes = 128 << 20  # v5e / v6e have 128 MiB VMEM
    except Exception:
        pass
    try:
        info = pltpu.get_tpu_info()
        vmem_bytes = int(getattr(info, "vmem_capacity_bytes", vmem_bytes))
    except Exception:
        pass
    # Bound the estimate so a surprising report can't blow the budget.
    return max(16 << 20, min(vmem_bytes, 128 << 20)), megacore


def _pick_row_tile(n_rows, n_classes, itemsize, vmem_bytes):
    """Largest row tile whose full f32 working set fits comfortably in VMEM."""
    granule = max(8, 32 // itemsize)          # 8 for f32, 16 for bf16, 32 for int8
    # Per-row working set: double-buffered native logits block + in-kernel f32
    # shifted copy and exp() temporary + a handful of lane-sparse (row, 1)
    # intermediates that each occupy a full vreg row (512 B).
    per_row = 2 * n_classes * itemsize + 2 * n_classes * 4 + 6 * 512
    budget = int(0.45 * vmem_bytes)           # headroom for compiler scratch
    cap = budget // max(1, per_row)
    cap = min(cap, 8192)                      # diminishing returns / unroll limit
    cap = max(granule, (cap // 32) * 32)
    if n_rows <= cap:
        return n_rows                         # single full-dim block (always legal)
    return cap


def label_smoothing_cross_entropy(output, target, *, eps=0.1,
                                  ignore_index=-100, row_tile=None,
                                  num_splits=None):
    """Matches LabelSmoothingCrossEntropy(eps, reduction='mean', ignore_index).

    `output`: (N, C) logits in native dtype (f32 / bf16).  `target`: (N,) ints.
    """
    # TODO(synk): reduction='sum' / 'none' variants are not implemented
    # (PyTorch module default is 'mean').
    n_rows, n_classes = output.shape
    itemsize = jnp.dtype(output.dtype).itemsize
    vmem_bytes, megacore = _chip_info()

    granule = max(8, 32 // itemsize)
    if row_tile is None:
        row_tile = _pick_row_tile(n_rows, n_classes, itemsize, vmem_bytes)
    else:
        row_tile = min(int(row_tile), n_rows)
        if row_tile < n_rows:                 # tiled path needs sublane alignment
            row_tile = max(granule, (row_tile // granule) * granule)

    total_tiles = -(-n_rows // row_tile)
    if num_splits is None:
        # The core split is pure overhead on single-TensorCore chips (v5e/v6e).
        num_splits = 2 if megacore else 1
    num_splits = max(1, min(int(num_splits), total_tiles))
    tiles_per_split = -(-total_tiles // num_splits)

    target2d = target.reshape(n_rows, 1).astype(jnp.int32)

    def blk_index(s, t):
        gt = jnp.minimum(s * tiles_per_split + t, total_tiles - 1)
        return (gt, 0)

    kernel = functools.partial(
        _lsce_kernel,
        n_rows=n_rows, n_classes=n_classes, row_tile=row_tile,
        tiles_per_split=tiles_per_split, ignore_index=int(ignore_index),
    )

    # Explicit VMEM budget: double-buffered native logits block + in-kernel f32
    # shifted copy / exp temporary + lane-sparse per-row intermediates + output
    # blocks, with headroom.  Capped per generation (v7x has only 64 MiB/core).
    block_bytes = row_tile * n_classes * itemsize
    f32_bytes = row_tile * n_classes * 4
    needed = (2 * block_bytes + 2 * f32_bytes + 8 * row_tile * 512
              + 2 * 8 * 128 * 4 + (8 << 20))
    vmem_cap = min(int(0.85 * vmem_bytes), 96 << 20)   # ~54 MiB v7x, 96 MiB v5e/v6e
    vmem_limit = int(min(max(needed, 24 << 20), vmem_cap))

    partials = pl.pallas_call(
        kernel,
        out_shape=jax.ShapeDtypeStruct((num_splits, 8, 128), jnp.float32),
        grid_spec=pltpu.PrefetchScalarGridSpec(
            num_scalar_prefetch=0,
            grid=(num_splits, tiles_per_split),
            in_specs=[
                # TODO(synk): sweep pipeline_mode=pl.Buffered(3) on the logits
                # spec for huge-C inputs if DMA stays exposed on v7x.
                pl.BlockSpec((row_tile, n_classes), blk_index),
                pl.BlockSpec((row_tile, 1), blk_index),
            ],
            out_specs=pl.BlockSpec((1, 8, 128), lambda s, t: (s, 0, 0)),
            scratch_shapes=[
                pltpu.VMEM((1, 1), jnp.float32),   # running sum_j log p
                pltpu.VMEM((1, 1), jnp.float32),   # running -log p[target] (valid)
                pltpu.VMEM((1, 1), jnp.float32),   # running valid-row count
            ],
        ),
        compiler_params=pltpu.CompilerParams(
            # TODO(synk): on v7x verify "parallel" core-shards the split axis;
            # otherwise switch the leading axis to pltpu.CORE_PARALLEL.
            dimension_semantics=("parallel", "arbitrary"),
            vmem_limit_bytes=vmem_limit,
        ),
    )(output, target2d)

    # Combine per-split partials in plain JAX (tiny).
    sum_lp = partials[:, 0, 0].sum()
    sum_nll = partials[:, 1, 0].sum()
    cnt = partials[:, 2, 0].sum()

    smooth_mean = (-sum_lp) / jnp.float32(n_rows)       # averages over ALL rows
    nll_mean = sum_nll / cnt                            # averages over valid rows
    return smooth_mean * (eps / n_classes) + (1.0 - eps) * nll_mean


def _reference(output, target, eps=0.1, ignore_index=-100):
    """Pure-JAX reference mirroring the PyTorch forward (reduction='mean')."""
    c = output.shape[-1]
    logp = jax.nn.log_softmax(output.astype(jnp.float32), axis=-1)
    smooth = (-logp.sum(axis=-1)).mean()
    valid = target != ignore_index
    safe_t = jnp.where(valid, target, 0)
    picked = jnp.take_along_axis(logp, safe_t[:, None], axis=-1)[:, 0]
    nll = jnp.sum(jnp.where(valid, -picked, 0.0)) / jnp.sum(valid)
    return smooth * eps / c + (1.0 - eps) * nll


if __name__ == "__main__":
    key = jax.random.PRNGKey(0)
    k1, k2, k3, k4, k5, k6 = jax.random.split(key, 6)

    # 1) batch=2, seq=8 -> 16 rows, 128 classes, f32 logits (auto tile).
    N, C = 16, 128
    logits = jax.random.normal(k1, (N, C), dtype=jnp.float32)
    labels = jax.random.randint(k2, (N,), 0, C, dtype=jnp.int32)
    labels = labels.at[3].set(-100).at[11].set(-100)       # padding positions
    loss = jax.block_until_ready(
        label_smoothing_cross_entropy(logits, labels, eps=0.1))
    ref = _reference(logits, labels, eps=0.1)
    assert jnp.allclose(loss, ref, rtol=1e-4, atol=1e-4), (loss, ref)

    # 2) Non-divisible row count + forced small tile: exercises partial-block
    #    masking, the clamped index_map and (on megacore chips) the core split.
    N2, C2 = 20, 40
    logits2 = jax.random.normal(k3, (N2, C2), dtype=jnp.float32)
    labels2 = jax.random.randint(k4, (N2,), 0, C2, dtype=jnp.int32)
    labels2 = labels2.at[0].set(-100).at[17].set(-100)
    loss2 = jax.block_until_ready(
        label_smoothing_cross_entropy(logits2, labels2, eps=0.1, row_tile=8))
    ref2 = _reference(logits2, labels2, eps=0.1)
    assert jnp.allclose(loss2, ref2, rtol=1e-4, atol=1e-4), (loss2, ref2)

    # 3) Native bf16 logits streamed directly (max / target-pick stay in bf16).
    N3, C3 = 16, 128
    logits3 = jax.random.normal(k5, (N3, C3), dtype=jnp.bfloat16)
    labels3 = jax.random.randint(k6, (N3,), 0, C3, dtype=jnp.int32)
    labels3 = labels3.at[5].set(-100)
    loss3 = jax.block_until_ready(
        label_smoothing_cross_entropy(logits3, labels3, eps=0.1))
    ref3 = _reference(logits3, labels3, eps=0.1)
    assert jnp.allclose(loss3, ref3, rtol=1e-3, atol=1e-3), (loss3, ref3)

    print("KERNEL_OK")
</pallas_src>

<mosaic_0001>
module attributes {stable_mosaic.version = 11 : i64} {
  func.func @_lsce_kernel(%arg0: i32, %arg1: i32, %arg2: memref<16x128xf32, #tpu.memory_space<vmem>>, %arg3: memref<16x1xi32, #tpu.memory_space<vmem>>, %arg4: memref<1x8x128xf32, #tpu.memory_space<vmem>>, %arg5: memref<1x1xf32, #tpu.memory_space<vmem>>, %arg6: memref<1x1xf32, #tpu.memory_space<vmem>>, %arg7: memref<1x1xf32, #tpu.memory_space<vmem>>) attributes {dimension_semantics = [#tpu.dimension_semantics<parallel>, #tpu.dimension_semantics<arbitrary>], iteration_bounds = array<i64: 1, 1>, scalar_prefetch = 0 : i64, scratch_operands = 3 : i64, tpu.core_type = #tpu.core_type<tc>, window_params = [{transform_indices = @transform_0, window_bounds = array<i64: 16, 128>}, {transform_indices = @transform_1, window_bounds = array<i64: 16, 1>}, {transform_indices = @transform_2, window_bounds = array<i64: 1, 8, 128>}]} {
    %c0_i32 = arith.constant 0 : i32
    %0 = arith.cmpi eq, %arg1, %c0_i32 : i32
    %1 = arith.extui %0 : i1 to i32
    %c0_i32_0 = arith.constant 0 : i32
    %2 = arith.cmpi ne, %1, %c0_i32_0 : i32
    scf.if %2 {
      %cst_30 = arith.constant 0.000000e+00 : f32
      %74 = vector.broadcast %cst_30 : f32 to vector<1x1xf32>
      %c0_31 = arith.constant 0 : index
      %c0_32 = arith.constant 0 : index
      %75 = vector.load %arg5[%c0_31, %c0_32] : memref<1x1xf32, #tpu.memory_space<vmem>>, vector<1x1xf32>
      tpu.vector_store %arg5[%c0_31, %c0_32], %74 {strides = array<i32>} : memref<1x1xf32, #tpu.memory_space<vmem>>, vector<1x1xf32>,
      %cst_33 = arith.constant 0.000000e+00 : f32
      %76 = vector.broadcast %cst_33 : f32 to vector<1x1xf32>
      %c0_34 = arith.constant 0 : index
      %c0_35 = arith.constant 0 : index
      %77 = vector.load %arg6[%c0_34, %c0_35] : memref<1x1xf32, #tpu.memory_space<vmem>>, vector<1x1xf32>
      tpu.vector_store %arg6[%c0_34, %c0_35], %76 {strides = array<i32>} : memref<1x1xf32, #tpu.memory_space<vmem>>, vector<1x1xf32>,
      %cst_36 = arith.constant 0.000000e+00 : f32
      %78 = vector.broadcast %cst_36 : f32 to vector<1x1xf32>
      %c0_37 = arith.constant 0 : index
      %c0_38 = arith.constant 0 : index
      %79 = vector.load %arg7[%c0_37, %c0_38] : memref<1x1xf32, #tpu.memory_space<vmem>>, vector<1x1xf32>
      tpu.vector_store %arg7[%c0_37, %c0_38], %78 {strides = array<i32>} : memref<1x1xf32, #tpu.memory_space<vmem>>, vector<1x1xf32>,
    } else {
    }
    %c0 = arith.constant 0 : index
    %c0_1 = arith.constant 0 : index
    %3 = vector.load %arg2[%c0, %c0_1] : memref<16x128xf32, #tpu.memory_space<vmem>>, vector<16x128xf32>
    %c0_2 = arith.constant 0 : index
    %c0_3 = arith.constant 0 : index
    %4 = vector.load %arg3[%c0_2, %c0_3] : memref<16x1xi32, #tpu.memory_space<vmem>>, vector<16x1xi32>
    %c1_i32 = arith.constant 1 : i32
    %5 = arith.muli %arg0, %c1_i32 : i32
    %6 = arith.addi %5, %arg1 : i32
    %c16_i32 = arith.constant 16 : i32
    %7 = arith.muli %6, %c16_i32 : i32
    %8 = tpu.iota {dimensions = array<i32: 0>} : vector<16x1xi32>
    %9 = vector.broadcast %7 : i32 to vector<16x1xi32>
    %10 = arith.addi %9, %8 : vector<16x1xi32>
    %c16_i32_4 = arith.constant 16 : i32
    %11 = vector.broadcast %c16_i32_4 : i32 to vector<16x1xi32>
    %12 = arith.cmpi slt, %10, %11 : vector<16x1xi32>
    %cst = arith.constant dense<0xFF800000> : vector<16xf32>
    %13 = vector.multi_reduction <maximumf>, %3, %cst [1] : vector<16x128xf32> to vector<16xf32>
    %14 = vector.shape_cast %13 : vector<16xf32> to vector<16x1xf32>
    %15 = tpu.iota {dimensions = array<i32: 1>} : vector<1x128xi32>
    %16 = vector.broadcast %15 : vector<1x128xi32> to vector<16x128xi32>
    %17 = vector.broadcast %4 : vector<16x1xi32> to vector<16x128xi32>
    %18 = arith.cmpi eq, %16, %17 : vector<16x128xi32>
    %cst_5 = arith.constant 0.000000e+00 : f32
    %19 = vector.broadcast %cst_5 : f32 to vector<16x128xf32>
    %20 = arith.select %18, %3, %19 : vector<16x128xi1>, vector<16x128xf32>
    %cst_6 = arith.constant dense<0.000000e+00> : vector<16xf32>
    %21 = vector.multi_reduction <add>, %20, %cst_6 [1] : vector<16x128xf32> to vector<16xf32>
    %22 = vector.shape_cast %21 : vector<16xf32> to vector<16x1xf32>
    %23 = vector.broadcast %14 : vector<16x1xf32> to vector<16x128xf32>
    %24 = arith.subf %3, %23 : vector<16x128xf32>
    %25 = math.exp %24 : vector<16x128xf32>
    %cst_7 = arith.constant dense<0.000000e+00> : vector<16xf32>
    %26 = vector.multi_reduction <add>, %25, %cst_7 [1] : vector<16x128xf32> to vector<16xf32>
    %27 = vector.shape_cast %26 : vector<16xf32> to vector<16x1xf32>
    %28 = math.log %27 : vector<16x1xf32>
    %cst_8 = arith.constant dense<0.000000e+00> : vector<16xf32>
    %29 = vector.multi_reduction <add>, %24, %cst_8 [1] : vector<16x128xf32> to vector<16xf32>
    %30 = vector.shape_cast %29 : vector<16xf32> to vector<16x1xf32>
    %cst_9 = arith.constant 1.280000e+02 : f32
    %31 = vector.broadcast %cst_9 : f32 to vector<16x1xf32>
    %32 = arith.mulf %31, %28 : vector<16x1xf32>
    %33 = arith.subf %30, %32 : vector<16x1xf32>
    %34 = arith.subf %22, %14 : vector<16x1xf32>
    %35 = arith.subf %34, %28 : vector<16x1xf32>
    %c-100_i32 = arith.constant -100 : i32
    %36 = vector.broadcast %c-100_i32 : i32 to vector<16x1xi32>
    %37 = arith.cmpi ne, %4, %36 : vector<16x1xi32>
    %38 = arith.andi %12, %37 : vector<16x1xi1>
    %c0_10 = arith.constant 0 : index
    %c0_11 = arith.constant 0 : index
    %39 = vector.load %arg5[%c0_10, %c0_11] : memref<1x1xf32, #tpu.memory_space<vmem>>, vector<1x1xf32>
    %cst_12 = arith.constant 0.000000e+00 : f32
    %40 = vector.broadcast %cst_12 : f32 to vector<16x1xf32>
    %41 = arith.select %12, %33, %40 : vector<16x1xi1>, vector<16x1xf32>
    %42 = vector.shape_cast %41 : vector<16x1xf32> to vector<1x16x1xf32>
    %cst_13 = arith.constant dense<0.000000e+00> : vector<1xf32>
    %43 = vector.multi_reduction <add>, %42, %cst_13 [1, 2] : vector<1x16x1xf32> to vector<1xf32>
    %44 = vector.shape_cast %43 : vector<1xf32> to vector<1x1x1xf32>
    %45 = vector.extract %44[0, 0, 0] : f32 from vector<1x1x1xf32>
    %46 = vector.broadcast %45 : f32 to vector<1x1xf32>
    %47 = arith.addf %39, %46 : vector<1x1xf32>
    %c0_14 = arith.constant 0 : index
    %c0_15 = arith.constant 0 : index
    %48 = vector.load %arg5[%c0_14, %c0_15] : memref<1x1xf32, #tpu.memory_space<vmem>>, vector<1x1xf32>
    tpu.vector_store %arg5[%c0_14, %c0_15], %47 {strides = array<i32>} : memref<1x1xf32, #tpu.memory_space<vmem>>, vector<1x1xf32>,
    %c0_16 = arith.constant 0 : index
    %c0_17 = arith.constant 0 : index
    %49 = vector.load %arg6[%c0_16, %c0_17] : memref<1x1xf32, #tpu.memory_space<vmem>>, vector<1x1xf32>
    %cst_18 = arith.constant 0.000000e+00 : f32
    %50 = vector.broadcast %cst_18 : f32 to vector<16x1xf32>
    %51 = arith.subf %50, %35 : vector<16x1xf32>
    %cst_19 = arith.constant 0.000000e+00 : f32
    %52 = vector.broadcast %cst_19 : f32 to vector<16x1xf32>
    %53 = arith.select %38, %51, %52 : vector<16x1xi1>, vector<16x1xf32>
    %54 = vector.shape_cast %53 : vector<16x1xf32> to vector<1x16x1xf32>
    %cst_20 = arith.constant dense<0.000000e+00> : vector<1xf32>
    %55 = vector.multi_reduction <add>, %54, %cst_20 [1, 2] : vector<1x16x1xf32> to vector<1xf32>
    %56 = vector.shape_cast %55 : vector<1xf32> to vector<1x1x1xf32>
    %57 = vector.extract %56[0, 0, 0] : f32 from vector<1x1x1xf32>
    %58 = vector.broadcast %57 : f32 to vector<1x1xf32>
    %59 = arith.addf %49, %58 : vector<1x1xf32>
    %c0_21 = arith.constant 0 : index
    %c0_22 = arith.constant 0 : index
    %60 = vector.load %arg6[%c0_21, %c0_22] : memref<1x1xf32, #tpu.memory_space<vmem>>, vector<1x1xf32>
    tpu.vector_store %arg6[%c0_21, %c0_22], %59 {strides = array<i32>} : memref<1x1xf32, #tpu.memory_space<vmem>>, vector<1x1xf32>,
    %c0_23 = arith.constant 0 : index
    %c0_24 = arith.constant 0 : index
    %61 = vector.load %arg7[%c0_23, %c0_24] : memref<1x1xf32, #tpu.memory_space<vmem>>, vector<1x1xf32>
    %62 = arith.extui %38 : vector<16x1xi1> to vector<16x1xi32>
    %63 = arith.sitofp %62 : vector<16x1xi32> to vector<16x1xf32>
    %64 = vector.shape_cast %63 : vector<16x1xf32> to vector<1x16x1xf32>
    %cst_25 = arith.constant dense<0.000000e+00> : vector<1xf32>
    %65 = vector.multi_reduction <add>, %64, %cst_25 [1, 2] : vector<1x16x1xf32> to vector<1xf32>
    %66 = vector.shape_cast %65 : vector<1xf32> to vector<1x1x1xf32>
    %67 = vector.extract %66[0, 0, 0] : f32 from vector<1x1x1xf32>
    %68 = vector.broadcast %67 : f32 to vector<1x1xf32>
    %69 = arith.addf %61, %68 : vector<1x1xf32>
    %c0_26 = arith.constant 0 : index
    %c0_27 = arith.constant 0 : index
    %70 = vector.load %arg7[%c0_26, %c0_27] : memref<1x1xf32, #tpu.memory_space<vmem>>, vector<1x1xf32>
    tpu.vector_store %arg7[%c0_26, %c0_27], %69 {strides = array<i32>} : memref<1x1xf32, #tpu.memory_space<vmem>>, vector<1x1xf32>,
    %c0_i32_28 = arith.constant 0 : i32
    %71 = arith.cmpi eq, %arg1, %c0_i32_28 : i32
    %72 = arith.extui %71 : i1 to i32
    %c0_i32_29 = arith.constant 0 : i32
    %73 = arith.cmpi ne, %72, %c0_i32_29 : i32
    scf.if %73 {
      %c0_30 = arith.constant 0 : index
      %c0_31 = arith.constant 0 : index
      %74 = vector.load %arg5[%c0_30, %c0_31] : memref<1x1xf32, #tpu.memory_space<vmem>>, vector<1x1xf32>
      %75 = vector.shape_cast %74 : vector<1x1xf32> to vector<1x1x1xf32>
      %cst_32 = arith.constant dense<0.000000e+00> : vector<1xf32>
      %76 = vector.multi_reduction <add>, %75, %cst_32 [1, 2] : vector<1x1x1xf32> to vector<1xf32>
      %77 = vector.shape_cast %76 : vector<1xf32> to vector<1x1x1xf32>
      %78 = vector.extract %77[0, 0, 0] : f32 from vector<1x1x1xf32>
      %c0_33 = arith.constant 0 : index
      %c0_34 = arith.constant 0 : index
      %79 = vector.load %arg6[%c0_33, %c0_34] : memref<1x1xf32, #tpu.memory_space<vmem>>, vector<1x1xf32>
      %80 = vector.shape_cast %79 : vector<1x1xf32> to vector<1x1x1xf32>
      %cst_35 = arith.constant dense<0.000000e+00> : vector<1xf32>
      %81 = vector.multi_reduction <add>, %80, %cst_35 [1, 2] : vector<1x1x1xf32> to vector<1xf32>
      %82 = vector.shape_cast %81 : vector<1xf32> to vector<1x1x1xf32>
      %83 = vector.extract %82[0, 0, 0] : f32 from vector<1x1x1xf32>
      %c0_36 = arith.constant 0 : index
      %c0_37 = arith.constant 0 : index
      %84 = vector.load %arg7[%c0_36, %c0_37] : memref<1x1xf32, #tpu.memory_space<vmem>>, vector<1x1xf32>
      %85 = vector.shape_cast %84 : vector<1x1xf32> to vector<1x1x1xf32>
      %cst_38 = arith.constant dense<0.000000e+00> : vector<1xf32>
      %86 = vector.multi_reduction <add>, %85, %cst_38 [1, 2] : vector<1x1x1xf32> to vector<1xf32>
      %87 = vector.shape_cast %86 : vector<1xf32> to vector<1x1x1xf32>
      %88 = vector.extract %87[0, 0, 0] : f32 from vector<1x1x1xf32>
      %89 = tpu.iota {dimensions = array<i32: 1>} : vector<1x8x128xi32>
      %c0_i32_39 = arith.constant 0 : i32
      %90 = vector.broadcast %c0_i32_39 : i32 to vector<1x8x128xi32>
      %91 = arith.cmpi eq, %89, %90 : vector<1x8x128xi32>
      %c1_i32_40 = arith.constant 1 : i32
      %92 = vector.broadcast %c1_i32_40 : i32 to vector<1x8x128xi32>
      %93 = arith.cmpi eq, %89, %92 : vector<1x8x128xi32>
      %c2_i32 = arith.constant 2 : i32
      %94 = vector.broadcast %c2_i32 : i32 to vector<1x8x128xi32>
      %95 = arith.cmpi eq, %89, %94 : vector<1x8x128xi32>
      %cst_41 = arith.constant 0.000000e+00 : f32
      %96 = vector.broadcast %88 : f32 to vector<1x8x128xf32>
      %97 = vector.broadcast %cst_41 : f32 to vector<1x8x128xf32>
      %98 = arith.select %95, %96, %97 : vector<1x8x128xi1>, vector<1x8x128xf32>
      %99 = vector.broadcast %83 : f32 to vector<1x8x128xf32>
      %100 = arith.select %93, %99, %98 : vector<1x8x128xi1>, vector<1x8x128xf32>
      %101 = vector.broadcast %78 : f32 to vector<1x8x128xf32>
      %102 = arith.select %91, %101, %100 : vector<1x8x128xi1>, vector<1x8x128xf32>
      %c0_42 = arith.constant 0 : index
      %c0_43 = arith.constant 0 : index
      %c0_44 = arith.constant 0 : index
      %103 = vector.load %arg4[%c0_42, %c0_43, %c0_44] : memref<1x8x128xf32, #tpu.memory_space<vmem>>, vector<1x8x128xf32>
      tpu.vector_store %arg4[%c0_42, %c0_43, %c0_44], %102 {strides = array<i32>} : memref<1x8x128xf32, #tpu.memory_space<vmem>>, vector<1x8x128xf32>,
    } else {
    }
    return
  }
  func.func @transform_0(%arg0: i32, %arg1: i32) -> (i32, i32) {
    %c1_i32 = arith.constant 1 : i32
    %0 = arith.muli %arg0, %c1_i32 : i32
    %1 = arith.addi %0, %arg1 : i32
    %c0_i32 = arith.constant 0 : i32
    %2 = arith.minsi %1, %c0_i32 : i32
    %c0_i32_0 = arith.constant 0 : i32
    %c0_i32_1 = arith.constant 0 : i32
    return %2, %c0_i32_0 : i32, i32
  }
  func.func @transform_1(%arg0: i32, %arg1: i32) -> (i32, i32) {
    %c1_i32 = arith.constant 1 : i32
    %0 = arith.muli %arg0, %c1_i32 : i32
    %1 = arith.addi %0, %arg1 : i32
    %c0_i32 = arith.constant 0 : i32
    %2 = arith.minsi %1, %c0_i32 : i32
    %c0_i32_0 = arith.constant 0 : i32
    %c0_i32_1 = arith.constant 0 : i32
    return %2, %c0_i32_0 : i32, i32
  }
  func.func @transform_2(%arg0: i32, %arg1: i32) -> (i32, i32, i32) {
    %c0_i32 = arith.constant 0 : i32
    %c0_i32_0 = arith.constant 0 : i32
    %c0_i32_1 = arith.constant 0 : i32
    return %arg0, %c0_i32, %c0_i32_0 : i32, i32, i32
  }
}

</mosaic_0001>

<bundles_post_ra>
// kernel: tpu_custom_call.1
= control target key start
LH: loop header
LB: loop body
LE: loop exit
PB: predicated region body
PF: predicated region fallthrough
CT: control target
= control target key end

     0   :  { %v307_v2 = vmov 0   ;;  %s373_s0 = inlined_call_operand.vmem [shape: f32[16,128], index: 0, kind: input, shape index: {}]   ;;  %s374_s1 = inlined_call_operand.vmem [shape: s32[16,1], index: 1, kind: input, shape index: {}]   ;;  %s375_s2 = inlined_call_operand.hbm [shape: f32[1,8,128], index: 2, kind: output, shape index: {}]  }
   0x1   :  { %v84_v0 = vld [vmem:[%s373_s0] sm:$0xff]  ;;  %273 = vset.pattern.permute.xlu1 %v307_v2 }
   0x2   :  { %v331_v1 = vld [vmem:[%s374_s1] sm:$0xff]  ;;  %98 = vmax.xlane.f32.xlu0 %v84_v0 }
   0x3   :  { %7 = vsyncpa [#allocation6], 0  ;;  %v85_v3 = vld [vmem:[%s373_s0 + $0x8] sm:$0xff]  ;;  %105 = vperm.xlu1 %273, %v331_v1   ;;  %274 = vset.pattern.permute.xlu0 %v307_v2  ;;  %v90_v10 = vlaneseq  ;;  %vm144_vm2 = vcmp.ne.s32.totalorder %v331_v1, 4294967196  ;;  %v308_v19 = vmov 0.0   ;;  %vm151_vm4 = vcmask 7168  }
   0x4   :  { %v87_v4 = vld [vmem:[%s374_s1 + $0x8] sm:$0xff]  ;;  %v256_v20 = vsel %vm144_vm2, 1.0, %v308_v19  ;;  %vm80_vm5 = vcmask 0   ;;  %s309_s21 = smov [#allocation5]  }
   0x5   :  { %v103_v13 = vand.u32 127, %v90_v10  ;;  %vm145_vm3 = vcmp.ne.s32.totalorder %v87_v4, 4294967196  ;;  %v193_v22 = vsel %vm151_vm4, %v256_v20, 0.0  ;;  %81 = vst.msk [vmem:[#allocation2] sm:$0x1] %vm80_vm5, %v308_v19  ;;  %s236_s22 = sshll.u32 %s309_s21, 4  ;;  %s237_s22 = int_to_ptr.vmem [resolvable:$true] %s236_s22 }
   0x6   :  { %100 = vmax.xlane.f32.xlu0 %v85_v3  ;;  %v257_v21 = vsel %vm145_vm3, 1.0, %v308_v19  ;;  %82 = vst.msk [vmem:[#allocation3] sm:$0x1] %vm80_vm5, %v308_v19  ;;  %83 = vst.msk [vmem:[#allocation4] sm:$0x1] %vm80_vm5, %v308_v19  ;;  %s283_s23 = scalar_lea.vmem %s237_s22, 128  ;;  %p288_p1 = scmp.lt.s32.totalorder %s237_s22, %s237_s22 }
   0x7   :  { %108 = vperm.xlu1 %273, %v87_v4   ;;  %v194_v23 = vsel %vm151_vm4, %v257_v21, 0.0  ;;  %p284_p0 = scmp.ne.s32.totalorder %s237_s22, %s283_s23  ;;  %p289_p2 = scmp.lt.s32.totalorder %s283_s23, %s283_s23 }
   0x8   :  { %v195_v24 = vadd.f32 %v194_v23, %v193_v22  ;;  %v91_v23 = vshrl.u32 %v90_v10, 7 }
   0x9   :  { %p290_p3 = por %p289_p2, %p288_p1 }
   0xa   :  { %vm222_vm6 = vcmp.eq.s32.totalorder %v91_v23, 2  ;;  %vm221_vm7 = vcmp.eq.s32.totalorder %v91_v23, 1  ;;  %vm220_vm8 = vcmp.eq.s32.totalorder %v91_v23, 0 }
   0xb   :  { %p291_p4 = pnand %p290_p3, %p284_p0 }
  0x82   :  { %v106_v12 = vpop.permute.xlu1 %105 }
  0x83   :  { %vm110_vm0 = vcmp.eq.s32.totalorder %v103_v13, %v106_v12 }
  0x84   :  { %v112_v16 = vsel %vm110_vm0, %v84_v0, 0.0 }
  0x86   :  { %v109_v15 = vpop.permute.xlu1 %108 }
  0x87   :  { %vm111_vm1 = vcmp.eq.s32.totalorder %v103_v13, %v109_v15 }
  0x88   :  { %v113_v18 = vsel %vm111_vm1, %v85_v3, 0.0 }
  0x8f   :  { %v99_v5 = vpop.xlane.xlu0 %98 }
  0x90   :  { %v118_v6 = vsub.f32 %v84_v0, %v99_v5 }
  0x92   :  { %v120_v7 = vmul.f32 1.442695, %v118_v6 }
  0x93   :  { %v101_v8 = vpop.xlane.xlu0 %100 }
  0x94   :  { %275 = vpow2.f32 %v120_v7  ;;  %v119_v9 = vsub.f32 %v85_v3, %v101_v8 }
  0x96   :  { %v122_v11 = vmul.f32 1.442695, %v119_v9 }
  0x98   :  { %277 = vpow2.f32 %v122_v11  ;;  %v148_v11 = vld [vmem:[#allocation2] sm:$0x1] }
  0x9e   :  { %v276_v14 = vpop.eup %275 }
  0x9f   :  { %124 = vadd.xlane.f32.xlu0 %v276_v14  ;;  %v168_v14 = vld [vmem:[#allocation3] sm:$0x1] }
  0xa2   :  { %v278_v17 = vpop.eup %277 }
  0xa3   :  { %126 = vadd.xlane.f32.xlu1 %v278_v17  ;;  %114 = vadd.xlane.f32.xlu0 %v112_v16  ;;  %v188_v17 = vld [vmem:[#allocation4] sm:$0x1] }
  0xa7   :  { %116 = vadd.xlane.f32.xlu0 %v113_v18 }
  0xab   :  { %132 = vadd.xlane.f32.xlu0 %v118_v6 }
  0xaf   :  { %134 = vadd.xlane.f32.xlu0 %v119_v9 }
 0x12c   :  { %v125_v25 = vpop.xlane.xlu0 %124 }
 0x12d   :  { %279 = vlog2.f32 %v125_v25 }
 0x130   :  { %v127_v26 = vpop.xlane.xlu1 %126  ;;  %v115_v27 = vpop.xlane.xlu0 %114 }
 0x131   :  { %281 = vlog2.f32 %v127_v26  ;;  %v140_v31 = vsub.f32 %v115_v27, %v99_v5 }
 0x134   :  { %v117_v28 = vpop.xlane.xlu0 %116 }
 0x135   :  { %v141_v38 = vsub.f32 %v117_v28, %v101_v8 }
 0x137   :  { %v280_v29 = vpop.eup %279 }
 0x138   :  { %v129_v30 = vmul.f32 0.6931472, %v280_v29  ;;  %v133_v32 = vpop.xlane.xlu0 %132 }
 0x13a   :  { %v142_v33 = vsub.f32 %v140_v31, %v129_v30  ;;  %v136_v34 = vmul.f32 128.0, %v129_v30 }
 0x13b   :  { %v282_v35 = vpop.eup %281 }
 0x13c   :  { %v131_v36 = vmul.f32 0.6931472, %v282_v35  ;;  %v169_v37 = vsub.f32 0.0, %v142_v33  ;;  %v138_v40 = vsub.f32 %v133_v32, %v136_v34  ;;  %v135_v42 = vpop.xlane.xlu0 %134 }
 0x13e   :  { %v143_v39 = vsub.f32 %v141_v38, %v131_v36  ;;  %v137_v41 = vmul.f32 128.0, %v131_v36  ;;  %v171_v45 = vsel %vm144_vm2, %v169_v37, 0.0  ;;  %v152_v46 = vsel %vm151_vm4, %v138_v40, 0.0 }
 0x13f   :  { %v173_v50 = vsel %vm151_vm4, %v171_v45, 0.0 }
 0x140   :  { %v170_v43 = vsub.f32 0.0, %v143_v39  ;;  %v139_v44 = vsub.f32 %v135_v42, %v137_v41 }
 0x142   :  { %v153_v47 = vsel %vm151_vm4, %v139_v44, 0.0  ;;  %v172_v48 = vsel %vm145_vm3, %v170_v43, 0.0 }
 0x143   :  { %v154_v49 = vadd.f32 %v153_v47, %v152_v46  ;;  %v174_v51 = vsel %vm151_vm4, %v172_v48, 0.0 }
 0x144   :  { %v175_v52 = vadd.f32 %v174_v51, %v173_v50 }
 0x145   :  { %155 = vadd.xlane.f32.xlu0 %v154_v49 }
 0x149   :  { %176 = vadd.xlane.f32.xlu0 %v175_v52 }
 0x14d   :  { %196 = vadd.xlane.f32.xlu0 %v195_v24 }
 0x1d2   :  { %v156_v53 = vpop.xlane.xlu0 %155 }
 0x1d3   :  { %v157_v54 = vrot.slane %v156_v53, 4 }
 0x1d5   :  { %v158_v55 = vadd.f32 %v157_v54, %v156_v53 }
 0x1d6   :  { %v177_v56 = vpop.xlane.xlu0 %176 }
 0x1d7   :  { %v159_v57 = vrot.slane %v158_v55, 2  ;;  %v178_v58 = vrot.slane %v177_v56, 4 }
 0x1d9   :  { %v179_v59 = vadd.f32 %v178_v58, %v177_v56  ;;  %v160_v60 = vadd.f32 %v159_v57, %v158_v55 }
 0x1da   :  { %v197_v61 = vpop.xlane.xlu0 %196 }
 0x1db   :  { %v180_v62 = vrot.slane %v179_v59, 2  ;;  %v198_v63 = vrot.slane %v197_v61, 4  ;;  %v161_v0 = vrot.slane %v160_v60, 1 }
 0x1dd   :  { %v199_v1 = vadd.f32 %v198_v63, %v197_v61  ;;  %v162_v2 = vadd.f32 %v161_v0, %v160_v60  ;;  %v181_v3 = vadd.f32 %v180_v62, %v179_v59 }
 0x1df   :  { %v200_v4 = vrot.slane %v199_v1, 2  ;;  %258 = vpush %v162_v2  ;;  %v182_v5 = vrot.slane %v181_v3, 1 }
 0x1e1   :  { %v201_v6 = vadd.f32 %v200_v4, %v199_v1  ;;  %v183_v7 = vadd.f32 %v182_v5, %v181_v3 }
 0x1e3   :  { %260 = vpush %v183_v7  ;;  %v202_v8 = vrot.slane %v201_v6, 1 }
 0x1e5   :  { %v203_v9 = vadd.f32 %v202_v8, %v201_v6 }
 0x1e7   :  { %262 = vpush %v203_v9 }
 0x210   :  { %s259_s0 = spop %258 }
 0x211   :  { %v164_v12 = vstv %s259_s0 }
 0x212   :  { %v165_v13 = vadd.f32 %v164_v12, %v148_v11 }
 0x214   :  { %167 = vst.msk [vmem:[#allocation2] sm:$0x1] %vm80_vm5, %v165_v13  ;;  %s261_s1 = spop %260 }
 0x215   :  { %v185_v15 = vstv %s261_s1 }
 0x216   :  { %v186_v16 = vadd.f32 %v185_v15, %v168_v14 }
 0x218   :  { %187 = vst.msk [vmem:[#allocation3] sm:$0x1] %vm80_vm5, %v186_v16  ;;  %s263_s17 = spop %262 }
 0x219   :  { %v205_v18 = vstv %s263_s17 }
 0x21a   :  { %v206_v19 = vadd.f32 %v205_v18, %v188_v17 }
 0x21b   :  { %v211_v20 = vld [vmem:[#allocation2] sm:$0x1] }
 0x21c   :  { %207 = vst.msk [vmem:[#allocation4] sm:$0x1] %vm80_vm5, %v206_v19 }
 0x21d   :  { %264 = vpush %v211_v20 }
 0x21f   :  { %v214_v21 = vld [vmem:[#allocation3] sm:$0x1] }
 0x220   :  { %266 = vpush %v214_v21 }
 0x223   :  { %v217_v22 = vld [vmem:[#allocation4] sm:$0x1] }
 0x224   :  { %268 = vpush %v217_v22 }
 0x24e   :  { %s265_s18 = spop %264 }
 0x24f   :  { %v227_v27 = vstv %s265_s18 }
 0x251   :  { %s267_s19 = spop %266 }
 0x252   :  { %v225_v25 = vstv %s267_s19 }
 0x255   :  { %s269_s20 = spop %268 }
 0x256   :  { %v223_v24 = vstv %s269_s20 }
 0x257   :  { %v224_v26 = vsel %vm222_vm6, %v223_v24, 0.0 }
 0x258   :  { %v226_v28 = vsel %vm221_vm7, %v225_v25, %v224_v26 }
 0x259   :  { %v228_v29 = vsel %vm220_vm8, %v227_v27, %v226_v28 }
 0x25a   :  { %229 = vst [vmem:[#allocation5] sm:$0xff] %v228_v29 }
 0x25b   :  { %294 = shalt.err (!%p291_p4)
}
 0x25c   :  { %s295_s26 = scalar_lea.hbm %s375_s2, 128 }
 0x25d   :  { %p296_p5 = scmp.ne.s32.totalorder %s375_s2, %s295_s26  ;;  %p299_p6 = scmp.lt.u32.totalorder %s295_s26, %s375_s2 }
 0x25f   :  { %p301_p7 = pnand %p299_p6, %p296_p5 }
 0x261   :  { %304 = shalt.err (!%p301_p7)
}
 0x262   :  { %239 = dma.vmem_to_hbm [thread:$0]  %s237_s22, 128, %s375_s2, [#allocation6]  }
 0x263   :  { %305 = dma.done.wait [#allocation6], 128  }
 0x264   :  { %306 = vsyncadd [#allocation6], 4294967168 }
 0x265   :  { %243 = vsyncpa [#allocation6], 1 }

</bundles_post_ra>
